<compile_context>
chip_gen: v5e
topology: v5e:2x2
jax: 0.10.0
libtpu: 0.0.40
codegen_flags: <defaults>
</compile_context>

<pallas_src>
import jax
import jax.numpy as jnp
from jax import lax
from jax.experimental import pallas as pl
from jax.experimental.pallas import tpu as pltpu


def _cdiv(a, b):
    return -(-a // b)


def _round_up(x, m):
    return (x + m - 1) // m * m


def _segment_sum_pallas(h, index, num_graphs, *, node_tile_cap=2048, d_tile_cap=512):
    """Segment-sum of h (N, D) by `index` into (num_graphs, D), dtype preserving."""
    N, D = h.shape
    G = int(num_graphs)
    idx2d = index.astype(jnp.int32).reshape(N, 1)
    out_dtype = h.dtype

    # ---- node (reduction) tile: 128-granular, balanced, never exceeds N ----
    node_tile_cap = max(128, _round_up(node_tile_cap, 128))
    if N <= 128:
        node_tile = N                               # block == full dim (always legal)
    else:
        steps = _cdiv(N, node_tile_cap)
        node_tile = _round_up(_cdiv(N, steps), 128)  # balance the last tile
        node_tile = max(128, min(node_tile, (N // 128) * 128))
    num_n_tiles = _cdiv(N, node_tile)
    need_row_mask = (N % node_tile) != 0            # ragged last node tile

    # ---- feature tile: multiple of 128 (or full D when D<=128); >=2 tiles when possible ----
    if D <= 128:
        d_tile = D                                  # block == full dim (always legal)
    else:
        lane_blocks = _cdiv(D, 128)
        blocks_per_tile = max(1, min(max(1, d_tile_cap // 128), lane_blocks // 2))
        d_tile = 128 * blocks_per_tile              # <= D, multiple of 128
    num_d_tiles = _cdiv(D, d_tile)

    def kernel(idx_ref, h_ref, o_ref, acc_ref):
        step = pl.program_id(1)                     # innermost node / reduction axis

        @pl.when(step == 0)
        def _init():
            acc_ref[...] = jnp.zeros_like(acc_ref)

        h_val = h_ref[...]
        if not jnp.issubdtype(h_ref.dtype, jnp.floating):
            # TODO(synk): integer inputs go through f32 (v7x MXU has no int path).
            h_val = h_val.astype(jnp.float32)
        tn = h_val.shape[0]
        if need_row_mask:
            # Zero rows past N so stale / NaN VMEM in the ragged last node tile
            # can never reach the MXU (0 * NaN would poison the accumulator).
            row = step * tn + lax.broadcasted_iota(jnp.int32, (tn, 1), 0)
            h_val = jnp.where(row < N, h_val, jnp.zeros_like(h_val))

        gids = lax.broadcasted_iota(jnp.int32, (tn, G), 1)
        onehot = (idx_ref[...] == gids).astype(h_val.dtype)   # (tn, G); bad ids -> 0
        # acc[g, d] += sum_n onehot[n, g] * h[n, d]  (contract node axis of both)
        acc_ref[...] += lax.dot_general(
            onehot, h_val,
            dimension_numbers=(((0,), (0,)), ((), ())),
            preferred_element_type=jnp.float32)

        @pl.when(step == pl.num_programs(1) - 1)
        def _finalize():
            o_ref[...] = acc_ref[...].astype(o_ref.dtype)

    # ---- VMEM budget: computed requirement + slack (never the full v7x 64 MiB) ----
    itemsize = jnp.dtype(h.dtype).itemsize
    out_itemsize = jnp.dtype(out_dtype).itemsize
    d_vmem = _round_up(d_tile, 128)
    g_vmem = _round_up(max(G, 1), 8)
    vmem_need = (2 * node_tile * d_vmem * itemsize       # double-buffered h tiles
                 + 2 * node_tile * 128 * 4               # idx tiles (lane-padded)
                 + 2 * g_vmem * d_vmem * out_itemsize    # output block buffers
                 + g_vmem * d_vmem * 4)                  # f32 accumulator scratch
    vmem_limit = int(min(max(vmem_need + (6 << 20), 16 << 20), 48 << 20))

    cost = pl.CostEstimate(
        flops=2 * N * G * D,
        transcendentals=0,
        bytes_accessed=N * D * itemsize + N * 4 + G * D * out_itemsize)

    return pl.pallas_call(
        kernel,
        out_shape=jax.ShapeDtypeStruct((G, D), out_dtype),
        grid_spec=pltpu.PrefetchScalarGridSpec(
            num_scalar_prefetch=0,
            grid=(num_d_tiles, num_n_tiles),
            in_specs=[
                pl.BlockSpec((node_tile, 1), lambda j, i: (i, 0)),
                pl.BlockSpec((node_tile, d_tile), lambda j, i: (i, j)),
            ],
            out_specs=pl.BlockSpec((G, d_tile), lambda j, i: (0, j)),
            scratch_shapes=[pltpu.VMEM((G, d_tile), jnp.float32)],
        ),
        compiler_params=pltpu.CompilerParams(
            dimension_semantics=("parallel", "arbitrary"),
            vmem_limit_bytes=vmem_limit,
        ),
        cost_estimate=cost,
    )(idx2d, h)


def colour_readout(c, index, num_graphs, *, node_tile_cap=2048, d_tile_cap=512):
    """Pallas implementation of ColourReadout.forward(c, index)."""
    # TODO(synk): `self.readout` is an injected module in PyTorch; only the
    # global_add_pool (segment-sum) readout is implemented here.
    if isinstance(c, (list, tuple)):
        c = c[-1]
    N = c.shape[0]
    emb_dim = c.shape[-1]
    c_flat = c.reshape(N, -1)                       # flatten(start_dim=-2, end_dim=-1)
    y_flat = _segment_sum_pallas(c_flat, index, num_graphs,
                                 node_tile_cap=node_tile_cap, d_tile_cap=d_tile_cap)
    return y_flat.reshape(num_graphs, -1, emb_dim)  # unflatten(-1, (-1, emb_dim))


if __name__ == "__main__":
    key = jax.random.PRNGKey(0)
    k1, k2 = jax.random.split(key, 2)

    # Small shapes: N=64 nodes, K=4 colours, emb_dim=8, G=4 graphs.
    N, K, E = 64, 4, 8
    num_graphs = 4
    c = jax.random.normal(k1, (N, K, E), dtype=jnp.float32)
    index = jax.random.randint(k2, (N,), 0, num_graphs, dtype=jnp.int32)

    out = colour_readout(c, index, num_graphs)
    out = jax.block_until_ready(out)

    # Reference: pure-JAX segment sum + the same reshape glue.
    ref_flat = jax.ops.segment_sum(c.reshape(N, K * E), index,
                                   num_segments=num_graphs)
    ref = ref_flat.reshape(num_graphs, K, E)

    assert out.shape == (num_graphs, K, E)
    assert out.dtype == c.dtype
    assert jnp.allclose(out, ref, atol=1e-4, rtol=1e-4)

    print("KERNEL_OK")
</pallas_src>

<mosaic_0001>
module attributes {stable_mosaic.version = 11 : i64} {
  func.func @kernel(%arg0: i32, %arg1: i32, %arg2: memref<64x1xi32, #tpu.memory_space<vmem>>, %arg3: memref<64x32xf32, #tpu.memory_space<vmem>>, %arg4: memref<4x32xf32, #tpu.memory_space<vmem>>, %arg5: memref<4x32xf32, #tpu.memory_space<vmem>>) attributes {dimension_semantics = [#tpu.dimension_semantics<parallel>, #tpu.dimension_semantics<arbitrary>], iteration_bounds = array<i64: 1, 1>, scalar_prefetch = 0 : i64, scratch_operands = 1 : i64, tpu.core_type = #tpu.core_type<tc>, window_params = [{transform_indices = @transform_0, window_bounds = array<i64: 64, 1>}, {transform_indices = @transform_1, window_bounds = array<i64: 64, 32>}, {transform_indices = @transform_2, window_bounds = array<i64: 4, 32>}]} {
    %c0_i32 = arith.constant 0 : i32
    %0 = arith.cmpi eq, %arg1, %c0_i32 : i32
    %1 = arith.extui %0 : i1 to i32
    %c0_i32_0 = arith.constant 0 : i32
    %2 = arith.cmpi ne, %1, %c0_i32_0 : i32
    scf.if %2 {
      %cst_10 = arith.constant 0.000000e+00 : f32
      %17 = vector.broadcast %cst_10 : f32 to vector<4x32xf32>
      %c0_11 = arith.constant 0 : index
      %c0_12 = arith.constant 0 : index
      %18 = vector.load %arg5[%c0_11, %c0_12] : memref<4x32xf32, #tpu.memory_space<vmem>>, vector<4x32xf32>
      tpu.vector_store %arg5[%c0_11, %c0_12], %17 {strides = array<i32>} : memref<4x32xf32, #tpu.memory_space<vmem>>, vector<4x32xf32>,
    } else {
    }
    %c0 = arith.constant 0 : index
    %c0_1 = arith.constant 0 : index
    %3 = vector.load %arg3[%c0, %c0_1] : memref<64x32xf32, #tpu.memory_space<vmem>>, vector<64x32xf32>
    %4 = tpu.iota {dimensions = array<i32: 1>} : vector<64x4xi32>
    %c0_2 = arith.constant 0 : index
    %c0_3 = arith.constant 0 : index
    %5 = vector.load %arg2[%c0_2, %c0_3] : memref<64x1xi32, #tpu.memory_space<vmem>>, vector<64x1xi32>
    %6 = vector.broadcast %5 : vector<64x1xi32> to vector<64x4xi32>
    %7 = arith.cmpi eq, %6, %4 : vector<64x4xi32>
    %8 = arith.extui %7 : vector<64x4xi1> to vector<64x4xi32>
    %9 = arith.sitofp %8 : vector<64x4xi32> to vector<64x4xf32>
    %c0_4 = arith.constant 0 : index
    %c0_5 = arith.constant 0 : index
    %10 = vector.load %arg5[%c0_4, %c0_5] : memref<4x32xf32, #tpu.memory_space<vmem>>, vector<4x32xf32>
    %cst = arith.constant dense<0.000000e+00> : vector<4x32xf32>
    %11 = tpu.matmul %9, %3, %cst {dimension_numbers = #tpu.dot_dimension_numbers<[0], [0], [1], [1], [0, 1, 1, 1], [], []>} : vector<64x4xf32>, vector<64x32xf32>, vector<4x32xf32> -> vector<4x32xf32>
    %12 = arith.addf %10, %11 : vector<4x32xf32>
    %c0_6 = arith.constant 0 : index
    %c0_7 = arith.constant 0 : index
    %13 = vector.load %arg5[%c0_6, %c0_7] : memref<4x32xf32, #tpu.memory_space<vmem>>, vector<4x32xf32>
    tpu.vector_store %arg5[%c0_6, %c0_7], %12 {strides = array<i32>} : memref<4x32xf32, #tpu.memory_space<vmem>>, vector<4x32xf32>,
    %c0_i32_8 = arith.constant 0 : i32
    %14 = arith.cmpi eq, %arg1, %c0_i32_8 : i32
    %15 = arith.extui %14 : i1 to i32
    %c0_i32_9 = arith.constant 0 : i32
    %16 = arith.cmpi ne, %15, %c0_i32_9 : i32
    scf.if %16 {
      %c0_10 = arith.constant 0 : index
      %c0_11 = arith.constant 0 : index
      %17 = vector.load %arg5[%c0_10, %c0_11] : memref<4x32xf32, #tpu.memory_space<vmem>>, vector<4x32xf32>
      %c0_12 = arith.constant 0 : index
      %c0_13 = arith.constant 0 : index
      %18 = vector.load %arg4[%c0_12, %c0_13] : memref<4x32xf32, #tpu.memory_space<vmem>>, vector<4x32xf32>
      tpu.vector_store %arg4[%c0_12, %c0_13], %17 {strides = array<i32>} : memref<4x32xf32, #tpu.memory_space<vmem>>, vector<4x32xf32>,
    } else {
    }
    return
  }
  func.func @transform_0(%arg0: i32, %arg1: i32) -> (i32, i32) {
    %c0_i32 = arith.constant 0 : i32
    %c0_i32_0 = arith.constant 0 : i32
    return %arg1, %c0_i32 : i32, i32
  }
  func.func @transform_1(%arg0: i32, %arg1: i32) -> (i32, i32) {
    %c0_i32 = arith.constant 0 : i32
    return %arg1, %arg0 : i32, i32
  }
  func.func @transform_2(%arg0: i32, %arg1: i32) -> (i32, i32) {
    %c0_i32 = arith.constant 0 : i32
    %c0_i32_0 = arith.constant 0 : i32
    return %c0_i32, %arg0 : i32, i32
  }
}

</mosaic_0001>

<bundles_post_ra>
// kernel: tpu_custom_call.1
= control target key start
LH: loop header
LB: loop body
LE: loop exit
PB: predicated region body
PF: predicated region fallthrough
CT: control target
= control target key end

     0   :  { %v206_v2 = vmov 0   ;;  %s275_s0 = inlined_call_operand.vmem [shape: s32[64,1], index: 0, kind: input, shape index: {}]   ;;  %s276_s1 = inlined_call_operand.vmem [shape: f32[64,32], index: 1, kind: input, shape index: {}]   ;;  %s277_s2 = inlined_call_operand.hbm [shape: f32[4,32], index: 2, kind: output, shape index: {}]  }
   0x1   :  { %v30_v0 = vld [vmem:[%s275_s0 + $0x10] sm:$0xff]  ;;  %v28_v1 = vld [vmem:[%s275_s0] sm:$0xff]  ;;  %178 = vset.pattern.permute.xlu1 %v206_v2  ;;  %177 = vset.pattern.permute.xlu0 %v206_v2 }
   0x2   :  { %43 = vperm.xlu1 %178, %v30_v0   ;;  %37 = vperm.xlu0 %177, %v28_v1   ;;  %v32_v3 = vld [vmem:[%s275_s0 + $0x20] sm:$0xff] }
   0x3   :  { %7 = vsyncpa [#allocation4], 0  ;;  %179 = vset.pattern.permute.xlu2 %v206_v2  ;;  %v31_v4 = vld [vmem:[%s275_s0 + $0x18] sm:$0xff]  ;;  %v29_v5 = vld [vmem:[%s275_s0 + $0x8] sm:$0xff]  ;;  %v26_v9 = vlaneseq  ;;  %v207_v12 = vmov 0.0   ;;  %vm16_vm8 = vcmask 257024  }
   0x4   :  { %49 = vperm.xlu2 %179, %v32_v3   ;;  %v33_v6 = vld [vmem:[%s275_s0 + $0x28] sm:$0xff]  ;;  %v35_v7 = vld [vmem:[%s275_s0 + $0x38] sm:$0xff]  ;;  %v34_v8 = vld [vmem:[%s275_s0 + $0x30] sm:$0xff]  ;;  %17 = vst.msk [vmem:[#allocation2] sm:$0xf] %vm16_vm8, %v207_v12  ;;  %vm117_vm9 = vcmask 523264  }
   0x5   :  { %v27_v10 = vand.u32 127, %v26_v9  ;;  %v25_v21 = vld [vmem:[%s276_s1 + $0x38] sm:$0xff]  ;;  %v24_v22 = vld [vmem:[%s276_s1 + $0x30] sm:$0xff]  ;;  %v23_v23 = vld [vmem:[%s276_s1 + $0x28] sm:$0xff]  ;;  %s156_s15 = sshll.u32 %s277_s2, 4  ;;  %s157_s15 = int_to_ptr.hbm [resolvable:$true] %s156_s15 }
   0x6   :  { %129 = vmatpush.msra.mxu0 %v25_v21  ;;  %v22_v24 = vld [vmem:[%s276_s1 + $0x20] sm:$0xff]  ;;  %v21_v26 = vld [vmem:[%s276_s1 + $0x18] sm:$0xff]  ;;  %v20_v27 = vld [vmem:[%s276_s1 + $0x10] sm:$0xff] }
   0x7   :  { %v19_v29 = vld [vmem:[%s276_s1 + $0x8] sm:$0xff]  ;;  %v18_v30 = vld [vmem:[%s276_s1] sm:$0xff]  ;;  %s208_s1 = smov [#allocation3]  }
   0x8   :  { %130 = vmatpush.msra.mxu0 %v24_v22  ;;  %s154_s12 = sshll.u32 %s208_s1, 4  ;;  %s155_s12 = int_to_ptr.vmem [resolvable:$true] %s154_s12 }
   0xa   :  { %46 = vperm.xlu1 %178, %v31_v4   ;;  %40 = vperm.xlu0 %177, %v29_v5  }
   0xb   :  { %131 = vmatpush.msra.mxu0 %v23_v23  ;;  %v84_v37 = vld [vmem:[#allocation2] sm:$0xf] }
   0xc   :  { %52 = vperm.xlu2 %179, %v33_v6  }
   0xd   :  { %132 = vmatpush.msra.mxu0 %v22_v24 }
   0xf   :  { %133 = vmatpush.msra.mxu0 %v21_v26 }
  0x11   :  { %134 = vmatpush.msra.mxu0 %v20_v27 }
  0x12   :  { %58 = vperm.xlu1 %178, %v35_v7   ;;  %55 = vperm.xlu0 %177, %v34_v8  }
  0x13   :  { %135 = vmatpush.msra.mxu0 %v19_v29 }
  0x15   :  { %136 = vmatpush.msra.mxu0 %v18_v30 }
  0x5e   :  { %v50_v20 = vpop.permute.xlu2 %49 }
  0x5f   :  { %vm64_vm4 = vcmp.eq.s32.totalorder %v50_v20, %v27_v10 }
  0x60   :  { %v169_v25 = vsel %vm64_vm4, 1.0, %v207_v12 }
  0x66   :  { %v53_v28 = vpop.permute.xlu2 %52 }
  0x67   :  { %vm65_vm5 = vcmp.eq.s32.totalorder %v53_v28, %v27_v10 }
  0x68   :  { %v170_v31 = vsel %vm65_vm5, 1.0, %v207_v12 }
  0x74   :  { %v38_v11 = vpop.permute.xlu0 %37  ;;  %v44_v16 = vpop.permute.xlu1 %43 }
  0x75   :  { %vm60_vm0 = vcmp.eq.s32.totalorder %v38_v11, %v27_v10  ;;  %vm62_vm2 = vcmp.eq.s32.totalorder %v44_v16, %v27_v10 }
  0x76   :  { %v165_v13 = vsel %vm60_vm0, 1.0, %v207_v12  ;;  %v167_v17 = vsel %vm62_vm2, 1.0, %v207_v12 }
  0x77   :  { %85 = vxpose.xlu2.b32.start [1/8] (short) (narrow) %v165_v13, 8 }
  0x7c   :  { %v41_v14 = vpop.permute.xlu0 %40  ;;  %v47_v18 = vpop.permute.xlu1 %46 }
  0x7d   :  { %vm61_vm1 = vcmp.eq.s32.totalorder %v41_v14, %v27_v10  ;;  %vm63_vm3 = vcmp.eq.s32.totalorder %v47_v18, %v27_v10 }
  0x7e   :  { %v166_v15 = vsel %vm61_vm1, 1.0, %v207_v12  ;;  %v168_v19 = vsel %vm63_vm3, 1.0, %v207_v12 }
  0x7f   :  { %86 = vxpose.xlu2.b32.cont [2/8] (short) (narrow) %v166_v15, 8 }
  0x84   :  { %v56_v32 = vpop.permute.xlu0 %55  ;;  %v59_v34 = vpop.permute.xlu1 %58 }
  0x85   :  { %vm66_vm6 = vcmp.eq.s32.totalorder %v56_v32, %v27_v10  ;;  %vm67_vm7 = vcmp.eq.s32.totalorder %v59_v34, %v27_v10 }
  0x86   :  { %v171_v33 = vsel %vm66_vm6, 1.0, %v207_v12  ;;  %v172_v35 = vsel %vm67_vm7, 1.0, %v207_v12 }
  0x87   :  { %87 = vxpose.xlu2.b32.cont [3/8] (short) (narrow) %v167_v17, 8 }
  0x8f   :  { %88 = vxpose.xlu2.b32.cont [4/8] (short) (narrow) %v168_v19, 8 }
  0x97   :  { %89 = vxpose.xlu2.b32.cont [5/8] (short) (narrow) %v169_v25, 8 }
  0x9f   :  { %90 = vxpose.xlu2.b32.cont [6/8] (short) (narrow) %v170_v31, 8 }
  0xa7   :  { %91 = vxpose.xlu2.b32.cont [7/8] (short) (narrow) %v171_v33, 8 }
  0xaf   :  { %92 = vxpose.xlu2.b32.end [8/8] (short) (narrow) %v172_v35, 8 }
 0x110   :  { %v101_v36 = vpop.trf.xlu2 }
 0x111   :  { %173 = vmatmul.msk.f32.vlgmr.msra.gmra.mxu0 %vm117_vm9, %v101_v36 }
 0x18e   :  { %v138_v38 = vpop.f32.mrf.mxu0 }
 0x18f   :  { %v141_v39 = vadd.f32 %v138_v38, %v84_v37 }
 0x191   :  { %143 = vst.msk [vmem:[#allocation2] sm:$0xf] %vm16_vm8, %v141_v39 }
 0x198   :  { %v147_v40 = vld [vmem:[#allocation2] sm:$0xf] }
 0x199   :  { %148 = vst.msk [vmem:[#allocation3] sm:$0xf] %vm16_vm8, %v147_v40 }
 0x19a   :  { %159 = dma.vmem_to_hbm [thread:$0]  %s155_s12, 64, %s157_s15, [#allocation4]  }
 0x19b   :  { %204 = dma.done.wait [#allocation4], 64  }
 0x19c   :  { %205 = vsyncadd [#allocation4], 4294967232 }
 0x19d   :  { %164 = vsyncpa [#allocation4], 1 }

</bundles_post_ra>
